<compile_context>
chip_gen: v6e
topology: v6e:2x2x1
jax: 0.10.0
libtpu: 0.0.40
codegen_flags: <defaults>
</compile_context>

<pallas_src>
from functools import partial

import jax
import jax.numpy as jnp
from jax.experimental import pallas as pl
from jax.experimental.pallas import tpu as pltpu


def _plk_conv_kernel(x_ref, w_ref, b_ref, m_ref, o_ref, *, dim, K, W):
    """One batch element.

    x_ref: (1, CB, M)  f32   CB = dim (channel-restricted) or C (full), with
                             flattened spatial (M = H*W) on the lane axis.
    w_ref: (K*dim, K*dim) bf16, w[dy*dim + co, dx*dim + ci] = weight[co, ci, dy, dx]
    b_ref: (dim, 1)  f32
    m_ref: (K, Ms)   f32   per-horizontal-tap column-validity masks
    o_ref: (1, CB, M) f32
    """
    CB = x_ref.shape[1]
    M = x_ref.shape[2]
    Ms = m_ref.shape[1]          # M + 2*p*W
    p = K // 2
    E = p * (W + 1)              # zero extension on each side of the flat signal

    xb = x_ref[0]                # (CB, M) single aligned block load
    x_conv = xb[:dim, :]         # (dim, M)

    # Zero-extend along lanes so every tap becomes a contiguous lane slice.
    if E > 0:
        zpad = jnp.zeros((dim, E), x_conv.dtype)
        xe = jnp.concatenate([zpad, x_conv, zpad], axis=1)   # (dim, M + 2E)
    else:
        xe = x_conv

    # Width im2col: K shifted + edge-masked copies stacked on the sublane axis.
    rows = []
    for dx in range(K):
        shifted = xe[:, dx:dx + Ms]                   # (dim, Ms) lane shift only
        rows.append(shifted * m_ref[dx:dx + 1, :])    # zero taps that wrapped rows
    s = jnp.concatenate(rows, axis=0).astype(jnp.bfloat16)   # (K*dim, Ms)

    # All K*K taps in a single MXU matmul (contraction dim = K*dim), f32 acc.
    p_all = jnp.dot(w_ref[...], s, preferred_element_type=jnp.float32)  # (K*dim, Ms)

    # Vertical (dy) reduction: shifted accumulation of the partial products.
    acc = jnp.zeros((dim, M), jnp.float32)
    for dy in range(K):
        acc = acc + p_all[dy * dim:(dy + 1) * dim, dy * W:dy * W + M]
    y = (acc + b_ref[...]).astype(o_ref.dtype)        # (dim, M)

    if CB > dim:
        # Full-channel blocks: passthrough channels ride along in the same
        # block (still cheaper than a separate wrapper-level concatenate).
        y = jnp.concatenate([y, xb[dim:, :]], axis=0)
    o_ref[0] = y


@jax.jit
def plk_conv2d(x, weight, bias):
    """PLKConv2d forward.

    x:      (N, C, H, W) f32 (NCHW, PyTorch convention), C >= dim
    weight: (dim, dim, K, K)  (Cout, Cin, kH, kW, PyTorch convention)
    bias:   (dim,)
    """
    N, C, H, W = x.shape
    dim, dim_in, K, K2 = weight.shape
    assert dim_in == dim and K2 == K
    assert K % 2 == 1, "PLKConv2d uses padding=K//2; only odd K gives 'same' output"
    assert dim <= C
    p = K // 2
    M = H * W
    Ms = M + 2 * p * W

    # Channel-restricted blocks when dim is sublane-aligned (passthrough stays
    # untouched in HBM via aliasing); otherwise stream all C channels and copy
    # the passthrough inside the kernel.
    CB = dim if (dim == C or dim % 8 == 0) else C

    x3 = x.reshape(N, C, M)                           # free, row-major reshape
    # (Cout, Cin, Kh, Kw) -> (Kh*Cout, Kw*Cin) contraction layout, bf16 for MXU.
    w = jnp.transpose(weight, (2, 0, 3, 1)).reshape(K * dim, K * dim)
    w = w.astype(jnp.bfloat16)
    b = bias.reshape(dim, 1).astype(jnp.float32)
    # Column-validity masks: kill horizontal taps that wrapped to adjacent rows.
    col = jnp.arange(Ms, dtype=jnp.int32) % W
    off = jnp.arange(K, dtype=jnp.int32)[:, None] - p
    mask = ((col[None, :] + off >= 0) & (col[None, :] + off < W)).astype(x.dtype)

    out3 = pl.pallas_call(
        partial(_plk_conv_kernel, dim=dim, K=K, W=W),
        out_shape=jax.ShapeDtypeStruct((N, C, M), x.dtype),
        grid=(N,),
        in_specs=[
            pl.BlockSpec((1, CB, M), lambda n: (n, 0, 0)),
            pl.BlockSpec((K * dim, K * dim), lambda n: (0, 0)),
            pl.BlockSpec((dim, 1), lambda n: (0, 0)),
            pl.BlockSpec((K, Ms), lambda n: (0, 0)),
        ],
        out_specs=pl.BlockSpec((1, CB, M), lambda n: (n, 0, 0)),
        # Alias the whole tensor: unwritten (passthrough) regions keep the
        # input values, so no wrapper-level concatenate is ever needed.
        # (True in-place, as in PyTorch eval mode, when the caller donates x.)
        input_output_aliases={0: 0},
        compiler_params=pltpu.CompilerParams(
            dimension_semantics=("parallel",),        # lets v7x use both TCs
        ),
    )(x3, w, b, mask)
    return out3.reshape(N, C, H, W)


def _reference(x, weight, bias):
    """Pure-JAX reference (f32 lax conv) for correctness checking."""
    dim, _, K, _ = weight.shape
    p = K // 2
    y1 = jax.lax.conv_general_dilated(
        x[:, :dim], weight,
        window_strides=(1, 1),
        padding=((p, p), (p, p)),
        dimension_numbers=("NCHW", "OIHW", "NCHW"),
        precision=jax.lax.Precision.HIGHEST,
    ) + bias[None, :, None, None]
    return jnp.concatenate([y1, x[:, dim:]], axis=1)


def _run_case(N, C, dim, H, W, K):
    key = jax.random.PRNGKey(0)
    kx, kw, kb = jax.random.split(key, 3)
    x = jax.random.normal(kx, (N, C, H, W), dtype=jnp.float32)
    # trunc_normal_(std=0.02) equivalent, deterministic.
    weight = 0.02 * jax.random.truncated_normal(
        kw, -2.0, 2.0, (dim, dim, K, K), dtype=jnp.float32)
    # nn.Conv2d default bias init: uniform(-1/sqrt(fan_in), 1/sqrt(fan_in)).
    fan_in = dim * K * K
    bound = 1.0 / (fan_in ** 0.5)
    bias = jax.random.uniform(kb, (dim,), jnp.float32, -bound, bound)

    ref = _reference(x, weight, bias)                 # compute before the call
    out = jax.block_until_ready(plk_conv2d(x, weight, bias))

    assert out.shape == x.shape and out.dtype == x.dtype
    # bf16 MXU inputs with f32 accumulation -> small numeric difference.
    err = float(jnp.max(jnp.abs(out[:, :dim] - ref[:, :dim])))
    assert err < 2e-2, f"conv mismatch vs reference: max abs err {err}"
    # Passthrough channels must be bit-exact.
    assert bool(jnp.all(out[:, dim:] == ref[:, dim:])), "passthrough not exact"


if __name__ == "__main__":
    # dim < 8      -> full-channel blocks, passthrough copied inside the kernel.
    _run_case(N=2, C=8, dim=4, H=16, W=16, K=5)
    # dim % 8 == 0 -> channel-restricted blocks, passthrough untouched in HBM.
    _run_case(N=2, C=16, dim=8, H=16, W=16, K=3)
    print("KERNEL_OK")
</pallas_src>

<mosaic_0001>
module attributes {stable_mosaic.version = 11 : i64} {
  func.func @_plk_conv_kernel(%arg0: i32, %arg1: memref<1x8x256xf32, #tpu.memory_space<vmem>>, %arg2: memref<20x20xbf16, #tpu.memory_space<vmem>>, %arg3: memref<4x1xf32, #tpu.memory_space<vmem>>, %arg4: memref<5x320xf32, #tpu.memory_space<vmem>>, %arg5: memref<1x8x256xf32, #tpu.memory_space<vmem>>) attributes {dimension_semantics = [#tpu.dimension_semantics<parallel>], iteration_bounds = array<i64: 2>, scalar_prefetch = 0 : i64, scratch_operands = 0 : i64, tpu.core_type = #tpu.core_type<tc>, window_params = [{transform_indices = @transform_0, window_bounds = array<i64: 1, 8, 256>}, {pipeline_mode = #tpu.pipeline_mode<synchronous>, transform_indices = @transform_1, window_bounds = array<i64: 20, 20>}, {pipeline_mode = #tpu.pipeline_mode<synchronous>, transform_indices = @transform_2, window_bounds = array<i64: 4, 1>}, {pipeline_mode = #tpu.pipeline_mode<synchronous>, transform_indices = @transform_3, window_bounds = array<i64: 5, 320>}, {transform_indices = @transform_4, window_bounds = array<i64: 1, 8, 256>}]} {
    %c0 = arith.constant 0 : index
    %c0_0 = arith.constant 0 : index
    %c0_1 = arith.constant 0 : index
    %0 = vector.load %arg1[%c0, %c0_0, %c0_1] : memref<1x8x256xf32, #tpu.memory_space<vmem>>, vector<1x8x256xf32>
    %1 = vector.shape_cast %0 : vector<1x8x256xf32> to vector<8x256xf32>
    %2 = vector.extract_strided_slice %1 {offsets = [0, 0], sizes = [4, 256], strides = [1, 1]} : vector<8x256xf32> to vector<4x256xf32>
    %cst = arith.constant 0.000000e+00 : f32
    %3 = vector.broadcast %cst : f32 to vector<4x34xf32>
    %4 = tpu.concatenate %3, %2, %3 in 1 : vector<4x34xf32>, vector<4x256xf32>, vector<4x34xf32> -> vector<4x324xf32>
    %5 = vector.extract_strided_slice %4 {offsets = [0, 0], sizes = [4, 320], strides = [1, 1]} : vector<4x324xf32> to vector<4x320xf32>
    %c0_2 = arith.constant 0 : index
    %c0_3 = arith.constant 0 : index
    %6 = vector.load %arg4[%c0_2, %c0_3] : memref<5x320xf32, #tpu.memory_space<vmem>>, vector<1x320xf32>
    %7 = vector.broadcast %6 : vector<1x320xf32> to vector<4x320xf32>
    %8 = arith.mulf %5, %7 : vector<4x320xf32>
    %9 = vector.extract_strided_slice %4 {offsets = [0, 1], sizes = [4, 320], strides = [1, 1]} : vector<4x324xf32> to vector<4x320xf32>
    %c1 = arith.constant 1 : index
    %c0_4 = arith.constant 0 : index
    %10 = vector.load %arg4[%c1, %c0_4] : memref<5x320xf32, #tpu.memory_space<vmem>>, vector<1x320xf32>
    %11 = vector.broadcast %10 : vector<1x320xf32> to vector<4x320xf32>
    %12 = arith.mulf %9, %11 : vector<4x320xf32>
    %13 = vector.extract_strided_slice %4 {offsets = [0, 2], sizes = [4, 320], strides = [1, 1]} : vector<4x324xf32> to vector<4x320xf32>
    %c2 = arith.constant 2 : index
    %c0_5 = arith.constant 0 : index
    %14 = vector.load %arg4[%c2, %c0_5] : memref<5x320xf32, #tpu.memory_space<vmem>>, vector<1x320xf32>
    %15 = vector.broadcast %14 : vector<1x320xf32> to vector<4x320xf32>
    %16 = arith.mulf %13, %15 : vector<4x320xf32>
    %17 = vector.extract_strided_slice %4 {offsets = [0, 3], sizes = [4, 320], strides = [1, 1]} : vector<4x324xf32> to vector<4x320xf32>
    %c3 = arith.constant 3 : index
    %c0_6 = arith.constant 0 : index
    %18 = vector.load %arg4[%c3, %c0_6] : memref<5x320xf32, #tpu.memory_space<vmem>>, vector<1x320xf32>
    %19 = vector.broadcast %18 : vector<1x320xf32> to vector<4x320xf32>
    %20 = arith.mulf %17, %19 : vector<4x320xf32>
    %21 = vector.extract_strided_slice %4 {offsets = [0, 4], sizes = [4, 320], strides = [1, 1]} : vector<4x324xf32> to vector<4x320xf32>
    %c4 = arith.constant 4 : index
    %c0_7 = arith.constant 0 : index
    %22 = vector.load %arg4[%c4, %c0_7] : memref<5x320xf32, #tpu.memory_space<vmem>>, vector<1x320xf32>
    %23 = vector.broadcast %22 : vector<1x320xf32> to vector<4x320xf32>
    %24 = arith.mulf %21, %23 : vector<4x320xf32>
    %25 = tpu.concatenate %8, %12, %16, %20, %24 in 0 : vector<4x320xf32>, vector<4x320xf32>, vector<4x320xf32>, vector<4x320xf32>, vector<4x320xf32> -> vector<20x320xf32>
    %26 = arith.truncf %25 : vector<20x320xf32> to vector<20x320xbf16>
    %c0_8 = arith.constant 0 : index
    %c0_9 = arith.constant 0 : index
    %27 = vector.load %arg2[%c0_8, %c0_9] : memref<20x20xbf16, #tpu.memory_space<vmem>>, vector<20x20xbf16>
    %cst_10 = arith.constant dense<0.000000e+00> : vector<20x320xf32>
    %28 = tpu.matmul %27, %26, %cst_10 {dimension_numbers = #tpu.dot_dimension_numbers<[1], [0], [0], [1], [0, 0, 1, 1], [], []>} : vector<20x20xbf16>, vector<20x320xbf16>, vector<20x320xf32> -> vector<20x320xf32>
    %cst_11 = arith.constant 0.000000e+00 : f32
    %29 = vector.broadcast %cst_11 : f32 to vector<4x256xf32>
    %30 = vector.extract_strided_slice %28 {offsets = [0, 0], sizes = [4, 256], strides = [1, 1]} : vector<20x320xf32> to vector<4x256xf32>
    %31 = arith.addf %29, %30 : vector<4x256xf32>
    %32 = vector.extract_strided_slice %28 {offsets = [4, 16], sizes = [4, 256], strides = [1, 1]} : vector<20x320xf32> to vector<4x256xf32>
    %33 = arith.addf %31, %32 : vector<4x256xf32>
    %34 = vector.extract_strided_slice %28 {offsets = [8, 32], sizes = [4, 256], strides = [1, 1]} : vector<20x320xf32> to vector<4x256xf32>
    %35 = arith.addf %33, %34 : vector<4x256xf32>
    %36 = vector.extract_strided_slice %28 {offsets = [12, 48], sizes = [4, 256], strides = [1, 1]} : vector<20x320xf32> to vector<4x256xf32>
    %37 = arith.addf %35, %36 : vector<4x256xf32>
    %38 = vector.extract_strided_slice %28 {offsets = [16, 64], sizes = [4, 256], strides = [1, 1]} : vector<20x320xf32> to vector<4x256xf32>
    %39 = arith.addf %37, %38 : vector<4x256xf32>
    %c0_12 = arith.constant 0 : index
    %c0_13 = arith.constant 0 : index
    %40 = vector.load %arg3[%c0_12, %c0_13] : memref<4x1xf32, #tpu.memory_space<vmem>>, vector<4x1xf32>
    %41 = vector.broadcast %40 : vector<4x1xf32> to vector<4x256xf32>
    %42 = arith.addf %39, %41 : vector<4x256xf32>
    %43 = vector.extract_strided_slice %1 {offsets = [4, 0], sizes = [4, 256], strides = [1, 1]} : vector<8x256xf32> to vector<4x256xf32>
    %44 = tpu.concatenate %42, %43 in 0 : vector<4x256xf32>, vector<4x256xf32> -> vector<8x256xf32>
    %c0_14 = arith.constant 0 : index
    %c0_15 = arith.constant 0 : index
    %c0_16 = arith.constant 0 : index
    %45 = vector.load %arg5[%c0_14, %c0_15, %c0_16] : memref<1x8x256xf32, #tpu.memory_space<vmem>>, vector<1x8x256xf32>
    %46 = vector.shape_cast %45 : vector<1x8x256xf32> to vector<8x256xf32>
    %47 = vector.shape_cast %44 : vector<8x256xf32> to vector<1x8x256xf32>
    tpu.vector_store %arg5[%c0_14, %c0_15, %c0_16], %47 {strides = array<i32>} : memref<1x8x256xf32, #tpu.memory_space<vmem>>, vector<1x8x256xf32>,
    return
  }
  func.func @transform_0(%arg0: i32) -> (i32, i32, i32) {
    %c0_i32 = arith.constant 0 : i32
    %c0_i32_0 = arith.constant 0 : i32
    %c0_i32_1 = arith.constant 0 : i32
    return %arg0, %c0_i32, %c0_i32_0 : i32, i32, i32
  }
  func.func @transform_1(%arg0: i32) -> (i32, i32) {
    %c0_i32 = arith.constant 0 : i32
    %c0_i32_0 = arith.constant 0 : i32
    %c0_i32_1 = arith.constant 0 : i32
    return %c0_i32, %c0_i32_0 : i32, i32
  }
  func.func @transform_2(%arg0: i32) -> (i32, i32) {
    %c0_i32 = arith.constant 0 : i32
    %c0_i32_0 = arith.constant 0 : i32
    %c0_i32_1 = arith.constant 0 : i32
    return %c0_i32, %c0_i32_0 : i32, i32
  }
  func.func @transform_3(%arg0: i32) -> (i32, i32) {
    %c0_i32 = arith.constant 0 : i32
    %c0_i32_0 = arith.constant 0 : i32
    %c0_i32_1 = arith.constant 0 : i32
    return %c0_i32, %c0_i32_0 : i32, i32
  }
  func.func @transform_4(%arg0: i32) -> (i32, i32, i32) {
    %c0_i32 = arith.constant 0 : i32
    %c0_i32_0 = arith.constant 0 : i32
    %c0_i32_1 = arith.constant 0 : i32
    return %arg0, %c0_i32, %c0_i32_0 : i32, i32, i32
  }
}

</mosaic_0001>

<bundles_post_ra>
// kernel: plk_conv2d.1
= control target key start
LH: loop header
LB: loop body
LE: loop exit
PB: predicated region body
PF: predicated region fallthrough
CT: control target
= control target key end

     0   :  { %s826_s15 = smov 0   ;;  %s924_s0 = inlined_call_operand.vmem [shape: f32[2,8,256], index: 0, kind: input, shape index: {}, may-alias: {0,4}]   ;;  %s925_s1 = inlined_call_operand.vmem [shape: bf16[20,20], index: 1, kind: input, shape index: {}]   ;;  %s926_s2 = inlined_call_operand.vmem [shape: f32[4,1], index: 2, kind: input, shape index: {}]   ;;  %s927_s3 = inlined_call_operand.vmem [shape: f32[5,320], index: 3, kind: input, shape index: {}]   ;;  %s928_s4 = inlined_call_operand.vmem [shape: f32[2,8,256], index: 4, kind: output, shape index: {}, may-alias: {0,4}]  }
   0x1 LB: > { %s696_s16 = sadd.s32 4294967295, %s785_s15   ;;  %p700_p0 = scmp.ge.s32.totalorder %s785_s15, 1  ;;  %s785_s15 = sphi %s826_s15, %s14_s15  }
   0x2   : > { %p162_p1 = scmp.lt.s32.totalorder %s785_s15, 3 }
   0x4   : > { %p163_p2 = pnand %p700_p0, %p162_p1 }
   0x5   : > { %p188_p3 = scmp.lt.s32.totalorder (!%p163_p2), %s696_s16, 1  ;;  %s787_s23 = smov (!%p163_p2), 34  }
   0x6   : > { %166 = sbr.rel (%p163_p2) target bundleno = 634 (0x27a), region = 36  ;;  %s788_s24 = smov (!%p163_p2), 4  }
   0x7   : > { %s789_s27 = smov (!%p163_p2), 1   ;;  %s790_s6 = smov (!%p163_p2), 3  }
   0x8   : > { %s791_s7 = smov (!%p163_p2), 2   ;;  %s792_s10 = smov (!%p163_p2), 124  }
   0x9   : > { %s793_s11 = smov (!%p163_p2), 127   ;;  %s794_s14 = smov (!%p163_p2), 125  }
   0xa   : > { %s795_s17 = smov (!%p163_p2), 126   ;;  %s799_s25 = smov (!%p163_p2), 80  }
   0xb   : > { %v216_v0 = vlaneseq  ;;  %s930_s16 = smov (!%p188_p3, %s696_s16), 1  ;;  %v708_v2 = vld [vmem:[%s927_s3 + $0x4] ss:$8 sm:$0x7]  ;;  %vm207_vm0 = vcmask 277504   ;;  %vm345_vm1 = vcmask 31744  }
   0xc   : > { %s718_s19 = sshll.u32 %s930_s16, 4  ;;  %v705_v10 = vld [vmem:[%s927_s3 + $0x1] ss:$8 sm:$0x7]  ;;  %vm255_vm2 = vcmask 7168   ;;  %vm315_vm3 = vcmask 23552  }
   0xd   : > { %v217_v1 = vshrl.u32 %v216_v0, 7  ;;  %s192_s22 = scalar_lea.vmem %s924_s0, %s718_s19  ;;  %v707_v15 = vld [vmem:[%s927_s3 + $0x3] ss:$8 sm:$0x7]  ;;  %vm285_vm4 = vcmask 15360   ;;  %vm444_vm5 = vcmask 162816   ;;  %s197_s29 = scalar_lea.vmem %s928_s4, %s718_s19 }
   0xe   : > { %v845_v5 = vld [vmem:[%s192_s22] sm:$0xff]  ;;  %v848_v8 = vld [vmem:[%s192_s22 + $0x8] sm:$0xff]  ;;  %vm414_vm6 = vcmask 1014784   ;;  %vm451_vm7 = vcmask 1041408   ;;  %vm366_vm8 = vcmask 1039360   ;;  %vm399_vm9 = vcmask 1022976  }
   0xf   : > { %v218_v3 = vsub.s32 0, %v217_v1  ;;  %v222_v4 = vsub.s32 1, %v217_v1  ;;  %203 = vrot.lane.b32.xlu0 %v845_v5, %s787_s23  ;;  %v226_v7 = vsub.s32 2, %v217_v1  ;;  %v706_v18 = vld [vmem:[%s927_s3 + $0x2] ss:$8 sm:$0x7] }
  0x10   : > { %v214_v23 = vld [vmem:[%s927_s3] ss:$8 sm:$0x7]  ;;  %vm381_vm10 = vcmask 1031168   ;;  %vm420_vm11 = vcmask 1043456   ;;  %s800_s26 = smov 64  }
  0x11   : > { %v330_v6 = vrot.slane %v708_v2, %v218_v3  ;;  %v334_v9 = vrot.slane %v708_v2, %v222_v4  ;;  %v338_v11 = vrot.slane %v708_v2, %v226_v7  ;;  %v240_v12 = vrot.slane %v705_v10, %v218_v3 }
  0x12   : > { %v244_v13 = vrot.slane %v705_v10, %v222_v4  ;;  %v248_v14 = vrot.slane %v705_v10, %v226_v7  ;;  %v300_v16 = vrot.slane %v707_v15, %v218_v3  ;;  %v304_v17 = vrot.slane %v707_v15, %v222_v4 }
  0x13   : > { %339 = vrot.lane.b32.xlu1 %v330_v6, %s788_s24  ;;  %205 = vrot.lane.b32.xlu0 %v848_v8, %s787_s23  ;;  %v308_v19 = vrot.slane %v707_v15, %v226_v7  ;;  %v270_v20 = vrot.slane %v706_v18, %v218_v3  ;;  %v274_v21 = vrot.slane %v706_v18, %v222_v4  ;;  %s797_s23 = smov 112   ;;  %vm574_vm12 = vcmask 916480  }
  0x14   : > { %v278_v22 = vrot.slane %v706_v18, %v226_v7  ;;  %v219_v24 = vrot.slane %v214_v23, %v218_v3  ;;  %v223_v29 = vrot.slane %v214_v23, %v222_v4  ;;  %v227_v30 = vrot.slane %v214_v23, %v226_v7  ;;  %v876_v7 = vld [vmem:[%s925_s1] sm:$0xff]  }
  0x15   : > { %728 = vmatprep.mubr.msk.bf16.mxu1 %vm444_vm5, %v876_v7  ;;  %vm590_vm13 = vcmask 785408   ;;  %vm606_vm14 = vcmask 654336   ;;  %vm622_vm15 = vcmask 523264  }
  0x17   : > { %341 = vrot.lane.b32.xlu1 %v334_v9, %s788_s24  ;;  %343 = vrot.lane.b32.xlu0 %v338_v11, %s788_s24  ;;  %s798_s24 = smov 96  }
  0x1b   : > { %249 = vrot.lane.b32.xlu1 %v240_v12, %s789_s27  ;;  %251 = vrot.lane.b32.xlu0 %v244_v13, %s789_s27  ;;  %v796_v13 = vmov 0  }
  0x1c   : > { %493 = vmatprep.mubr.bf16.mxu0 %v796_v13  ;;  %775 = vset.pattern.permute.xlu1 %v796_v13 }
  0x1d   : > { %776 = vset.pattern.permute.xlu0 %v796_v13 }
  0x1f   : > { %253 = vrot.lane.b32.xlu1 %v248_v14, %s789_s27  ;;  %309 = vrot.lane.b32.xlu0 %v300_v16, %s790_s6 }
  0x23   : > { %311 = vrot.lane.b32.xlu1 %v304_v17, %s790_s6  ;;  %313 = vrot.lane.b32.xlu0 %v308_v19, %s790_s6  ;;  %v629_v17 = vld [vmem:[%s926_s2] sm:$0xf] }
  0x27   : > { %279 = vrot.lane.b32.xlu1 %v270_v20, %s791_s7  ;;  %281 = vrot.lane.b32.xlu0 %v274_v21, %s791_s7 }
  0x2b   : > { %283 = vrot.lane.b32.xlu1 %v278_v22, %s791_s7 }
  0x81   : > { %v204_v25 = vpop.permute.xlu0 %203 }
  0x82   : > { %v863_v26 = vsel %vm207_vm0, 0.0, %v204_v25 }
  0x83   : > { %v866_v28 = vmul.f32 %v219_v24, %v863_v26 }
  0x85   : > { %v340_v27 = vpop.permute.xlu1 %339  ;;  %v206_v31 = vpop.permute.xlu0 %205 }
  0x86   : > { %v208_v32 = vsel %vm207_vm0, %v204_v25, %v206_v31  ;;  %v213_v33 = vsel %vm207_vm0, %v206_v31, 0.0  ;;  %v351_v38 = vmul.f32 %v340_v27, %v863_v26 }
  0x87   : > { %v868_v35 = vmul.f32 %v223_v29, %v208_v32  ;;  %v870_v36 = vmul.f32 %v227_v30, %v213_v33 }
  0x89   : > { %v342_v34 = vpop.permute.xlu1 %341  ;;  %v344_v40 = vpop.permute.xlu0 %343 }
  0x8a   : > { %v346_v37 = vsel %vm345_vm1, %v340_v27, %v342_v34  ;;  %v347_v41 = vsel %vm345_vm1, %v342_v34, %v344_v40 }
  0x8b   : > { %v352_v39 = vmul.f32 %v346_v37, %v208_v32  ;;  %v353_v44 = vmul.f32 %v347_v41, %v213_v33 }
  0x8d   : > { %v250_v42 = vpop.permute.xlu1 %249  ;;  %v755_v43 = vpack.i.bf16 %v352_v39, %v351_v38  ;;  %412 = vrot.lane.b32.xlu1 %v353_v44, %s792_s10  ;;  %v252_v45 = vpop.permute.xlu0 %251 }
  0x8e   : > { %v256_v46 = vsel %vm255_vm2, %v250_v42, %v252_v45  ;;  %v261_v10 = vmul.f32 %v250_v42, %v863_v26 }
  0x8f   : > { %756 = vrot.lane.b32.xlu0 %v755_v43, %s792_s10  ;;  %v262_v48 = vmul.f32 %v256_v46, %v208_v32 }
  0x90   : > { %v357_v14 = vrot.slane %v261_v10, 4 }
  0x91   : > { %v254_v47 = vpop.permute.xlu1 %253  ;;  %v358_v51 = vrot.slane %v262_v48, 4  ;;  %v310_v52 = vpop.permute.xlu0 %309 }
  0x92   : > { %v257_v49 = vsel %vm255_vm2, %v252_v45, %v254_v47  ;;  %v321_v15 = vmul.f32 %v310_v52, %v863_v26 }
  0x93   : > { %v263_v50 = vmul.f32 %v257_v49, %v213_v33 }
  0x94   : > { %v390_v16 = vrot.slane %v321_v15, 4 }
  0x95   : > { %v359_v53 = vrot.slane %v263_v50, 4  ;;  %v312_v54 = vpop.permute.xlu1 %311  ;;  %v314_v58 = vpop.permute.xlu0 %313 }
  0x96   : > { %v316_v55 = vsel %vm315_vm3, %v310_v52, %v312_v54  ;;  %v317_v59 = vsel %vm315_vm3, %v312_v54, %v314_v58  ;;  %v778_v52 = vld [vmem:[%s925_s1 + $0x8] ss:$0 sps:$4 sm:$0x33]  }
  0x97   : > { %v765_v56 = vpack.i.bf16 %v359_v53, %v358_v51  ;;  %v322_v57 = vmul.f32 %v316_v55, %v208_v32  ;;  %v323_v61 = vmul.f32 %v317_v59, %v213_v33 }
  0x99   : > { %v280_v60 = vpop.permute.xlu1 %279  ;;  %766 = vrot.lane.b32.xlu0 %v765_v56, %s793_s11  ;;  %v391_v62 = vrot.slane %v322_v57, 4  ;;  %v392_v63 = vrot.slane %v323_v61, 4  ;;  %v282_v0 = vpop.permute.xlu0 %281 }
  0x9a   : > { %v286_v1 = vsel %vm285_vm4, %v280_v60, %v282_v0  ;;  %v291_v12 = vmul.f32 %v280_v60, %v863_v26 }
  0x9b   : > { %v292_v3 = vmul.f32 %v286_v1, %v208_v32  ;;  %v770_v6 = vpack.i.bf16 %v392_v63, %v391_v62 }
  0x9d   : > { %v284_v2 = vpop.permute.xlu1 %283  ;;  %771 = vrot.lane.b32.xlu0 %v770_v6, %s794_s14 }
  0x9e   : > { %v287_v4 = vsel %vm285_vm4, %v282_v0, %v284_v2 }
  0x9f   : > { %v293_v9 = vmul.f32 %v287_v4, %v213_v33 }
  0xa1   : > { %v760_v11 = vpack.i.bf16 %v293_v9, %v292_v3  ;;  %375 = vrot.lane.b32.xlu0 %v291_v12, %s795_s17 }
  0xa3   : > { %761 = vrot.lane.b32.xlu1 %v760_v11, %s795_s17 }
  0xa7   : > { %360 = vrot.lane.b32.xlu1 %v357_v14, %s793_s11 }
  0xab   : > { %393 = vrot.lane.b32.xlu1 %v390_v16, %s794_s14 }
  0xaf   : > { %632 = vperm.xlu1 %775, %v629_v17  }
  0xff   : > { %v413_v21 = vpop.permute.xlu1 %412 }
 0x100   : > { %v432_v22 = vpack.c.bf16 %v413_v21, %v413_v21 }
 0x101   : > { %v757_v18 = vpop.permute.xlu0 %756 }
 0x102   : > { %v759_v19 = vunpack.i.h.bf16 %v757_v18  ;;  %v758_v20 = vunpack.i.l.bf16 %v757_v18  ;;  %732 = vmatprep.subr.msk.bf16.mxu1 %vm451_vm7, %v432_v22  ;;  %v459_v25 = vsel %vm451_vm7, %v432_v22, 0 }
 0x103   : > { %725 = vmatpush3.bf16.msra.mxu1 %v459_v25 }
 0x104   : > { %v416_v23 = vsel %vm414_vm6, %v759_v19, %v413_v21  ;;  %v415_v24 = vsel %vm414_vm6, %v758_v20, %v759_v19 }
 0x105   : > { %v431_v26 = vpack.c.bf16 %v416_v23, %v416_v23  ;;  %v430_v27 = vpack.c.bf16 %v415_v24, %v415_v24 }
 0x107   : > { %711 = vmatprep.subr.msk.bf16.mxu0 %vm451_vm7, %v431_v26  ;;  %v453_v29 = vsel %vm451_vm7, %v430_v27, 0 }
 0x108   : > { %474 = vmatpush1.bf16.msra.mxu0 %v453_v29 }
 0x10b   : > { %v767_v30 = vpop.permute.xlu0 %766 }
 0x10c   : > { %v769_v31 = vunpack.i.h.bf16 %v767_v30  ;;  %v768_v32 = vunpack.i.l.bf16 %v767_v30 }
 0x10e   : > { %v368_v41 = vsel %vm366_vm8, %v768_v32, %v769_v31  ;;  %v423_v44 = vsel %vm420_vm11, %v870_v36, %v769_v31 }
 0x10f   : > { %v772_v33 = vpop.permute.xlu0 %771  ;;  %v422_v48 = vsel %vm420_vm11, %v868_v35, %v368_v41 }
 0x110   : > { %v774_v34 = vunpack.i.h.bf16 %v772_v33  ;;  %v773_v37 = vunpack.i.l.bf16 %v772_v33 }
 0x112   : > { %v401_v42 = vsel %vm399_vm9, %v773_v37, %v774_v34 }
 0x113   : > { %v376_v51 = vpop.permute.xlu0 %375 }
 0x115   : > { %v762_v38 = vpop.permute.xlu1 %761 }
 0x116   : > { %v764_v39 = vunpack.i.h.bf16 %v762_v38  ;;  %v763_v40 = vunpack.i.l.bf16 %v762_v38 }
 0x118   : > { %v383_v43 = vsel %vm381_vm10, %v763_v40, %v764_v39  ;;  %v426_v45 = vsel %vm420_vm11, %v764_v39, %v774_v34  ;;  %v382_v54 = vsel %vm381_vm10, %v376_v51, %v763_v40 }
 0x119   : > { %v361_v46 = vpop.permute.xlu1 %360  ;;  %v429_v47 = vpack.c.bf16 %v426_v45, %v423_v44  ;;  %v425_v49 = vsel %vm420_vm11, %v383_v43, %v401_v42 }
 0x11a   : > { %v428_v50 = vpack.c.bf16 %v425_v49, %v422_v48  ;;  %v367_v53 = vsel %vm366_vm8, %v361_v46, %v768_v32 }
 0x11b   : > { %726 = vmatprep.subr.bf16.mxu1 %v429_v47  ;;  %v421_v35 = vsel %vm420_vm11, %v866_v28, %v367_v53 }
 0x11c   : > { %475 = vmatprep.subr.bf16.mxu0 %v428_v50  ;;  %727 = vmatpush3.bf16.msra.mxu1 %v429_v47 }
 0x11d   : > { %v394_v36 = vpop.permute.xlu1 %393 }
 0x11e   : > { %v400_v55 = vsel %vm399_vm9, %v394_v36, %v773_v37 }
 0x11f   : > { %v424_v56 = vsel %vm420_vm11, %v382_v54, %v400_v55  ;;  %729 = vmatmul.mubr.msk.bf16.vlgmr.msra.gmra.mxu1 %vm444_vm5, %v778_v52 }
 0x120   : > { %v427_v57 = vpack.c.bf16 %v424_v56, %v421_v35 }
 0x122   : > { %476 = vmatpush1.bf16.msra.mxu0 %v427_v57 }
 0x125   : > { %712 = vmatmul.mubr.msk.bf16.vlgmr.msra.gmra.mxu0 %vm444_vm5, %v876_v7 }
 0x126   : > { %503 = vmatprep.mubr.bf16.mxu0 %v796_v13 }
 0x12a   : > { %v633_v13 = vpop.permute.xlu1 %632 }
 0x12d   : > { %713 = vmatmul.mubr.msk.bf16.gmra.mxu0 %vm444_vm5, %v778_v52 }
 0x1df   : > { %v730_v58 = vpop.f32.mrf.mxu1 }
 0x1e1   : > { %v546_v59 = vpop.f32.mrf.mxu1 }
 0x1e2   : > { %v567_v1 = vrot.slane %v546_v59, 4 }
 0x1e3   : > { %v731_v60 = vpop.f32.mrf.mxu1 }
 0x1e5   : > { %v495_v61 = vpop.f32.mrf.mxu0  ;;  %v549_v6 = vpop.f32.mrf.mxu1 }
 0x1e6   : > { %v565_v62 = vrot.slane %v495_v61, 4  ;;  %v599_v12 = vrot.slane %v549_v6, 4 }
 0x1e7   : > { %v497_v63 = vpop.f32.mrf.mxu0 }
 0x1e8   : > { %v566_v28 = vrot.slane %v497_v63, 4  ;;  %568 = vrot.lane.b32.xlu0 %v565_v62, %s797_s23 }
 0x1e9   : > { %v499_v0 = vpop.f32.mrf.mxu0 }
 0x1ea   : > { %570 = vrot.lane.b32.xlu1 %v566_v28, %s797_s23  ;;  %v597_v9 = vrot.slane %v499_v0, 4 }
 0x1eb   : > { %v501_v2 = vpop.f32.mrf.mxu0 }
 0x1ec   : > { %572 = vrot.lane.b32.xlu0 %v567_v1, %s797_s23  ;;  %v598_v11 = vrot.slane %v501_v2, 4 }
 0x1ed   : > { %v505_v3 = vpop.f32.mrf.mxu0 }
 0x1ee   : > { %584 = vrot.lane.b32.xlu1 %v499_v0, %s798_s24 }
 0x1ef   : > { %v507_v4 = vpop.f32.mrf.mxu0 }
 0x1f0   : > { %586 = vrot.lane.b32.xlu0 %v501_v2, %s798_s24 }
 0x1f1   : > { %v509_v7 = vpop.f32.mrf.mxu0 }
 0x1f2   : > { %588 = vrot.lane.b32.xlu1 %v549_v6, %s798_s24 }
 0x1f3   : > { %v510_v10 = vpop.f32.mrf.mxu0 }
 0x1f4   : > { %600 = vrot.lane.b32.xlu0 %v597_v9, %s799_s25 }
 0x1f6   : > { %602 = vrot.lane.b32.xlu1 %v598_v11, %s799_s25 }
 0x1f8   : > { %604 = vrot.lane.b32.xlu0 %v599_v12, %s799_s25 }
 0x1fa   : > { %618 = vrot.lane.b32.xlu1 %v507_v4, %s800_s26 }
 0x1fc   : > { %616 = vrot.lane.b32.xlu0 %v505_v3, %s800_s26 }
 0x200   : > { %620 = vrot.lane.b32.xlu0 %v730_v58, %s800_s26 }
 0x25a   : > { %v569_v14 = vpop.permute.xlu0 %568 }
 0x25c   : > { %v571_v15 = vpop.permute.xlu1 %570 }
 0x25d   : > { %v575_v21 = vsel %vm574_vm12, %v569_v14, %v571_v15 }
 0x25e   : > { %v573_v16 = vpop.permute.xlu0 %572  ;;  %v579_v24 = vadd.f32 %v575_v21, %v495_v61 }
 0x25f   : > { %v576_v26 = vsel %vm574_vm12, %v571_v15, %v573_v16 }
 0x260   : > { %v585_v17 = vpop.permute.xlu1 %584  ;;  %v580_v32 = vadd.f32 %v576_v26, %v497_v63 }
 0x262   : > { %v587_v18 = vpop.permute.xlu0 %586 }
 0x263   : > { %v591_v23 = vsel %vm590_vm13, %v585_v17, %v587_v18 }
 0x264   : > { %v589_v19 = vpop.permute.xlu1 %588  ;;  %v595_v29 = vadd.f32 %v591_v23, %v579_v24 }
 0x265   : > { %v592_v31 = vsel %vm590_vm13, %v587_v18, %v589_v19 }
 0x266   : > { %v601_v20 = vpop.permute.xlu0 %600  ;;  %v596_v39 = vadd.f32 %v592_v31, %v580_v32 }
 0x268   : > { %v603_v22 = vpop.permute.xlu1 %602 }
 0x269   : > { %v607_v27 = vsel %vm606_vm14, %v601_v20, %v603_v22 }
 0x26a   : > { %v605_v25 = vpop.permute.xlu0 %604  ;;  %v611_v33 = vadd.f32 %v607_v27, %v595_v29 }
 0x26b   : > { %v608_v37 = vsel %vm606_vm14, %v603_v22, %v605_v25 }
 0x26c   : > { %v619_v30 = vpop.permute.xlu1 %618  ;;  %v612_v41 = vadd.f32 %v608_v37, %v596_v39 }
 0x26e   : > { %v617_v34 = vpop.permute.xlu0 %616 }
 0x26f   : > { %v623_v38 = vsel %vm622_vm15, %v617_v34, %v619_v30 }
 0x270   : > { %v627_v40 = vadd.f32 %v623_v38, %v611_v33 }
 0x272   : > { %v635_v42 = vadd.f32 %v633_v13, %v627_v40  ;;  %v621_v43 = vpop.permute.xlu0 %620 }
 0x273   : > { %v624_v44 = vsel %vm622_vm15, %v619_v30, %v621_v43 }
 0x274   : > { %v637_v45 = vsel %vm420_vm11, %v635_v42, %v845_v5  ;;  %v628_v46 = vadd.f32 %v624_v44, %v612_v41 }
 0x275   : > { %639 = vst [vmem:[%s197_s29] sm:$0xff] %v637_v45 }
 0x276   : > { %v636_v47 = vadd.f32 %v633_v13, %v628_v46 }
 0x278   : > { %v638_v48 = vsel %vm420_vm11, %v636_v47, %v848_v8 }
 0x279   : > { %640 = vst [vmem:[%s197_s29 + $0x8] sm:$0xff] %v638_v48 }
 0x27a PF: > { %s14_s15 = sadd.s32 1, %s785_s15  }
 0x27b   : > { %p11_p4 = scmp.ge.s32.totalorder %s14_s15, 4  }
 0x27d   :  { %13 = sbr.rel (!%p11_p4) target bundleno = 1 (0x1), region = 70 }

</bundles_post_ra>
